<compile_context>
chip_gen: v7x
topology: tpu7x:2x2x1
jax: 0.10.0
libtpu: 0.0.40
codegen_flags: <defaults>
</compile_context>

<pallas_src>
import functools
import jax
import jax.numpy as jnp
from jax.experimental import pallas as pl
from jax.experimental.pallas import tpu as pltpu

# ---- model sizes (FLNSSM: input_dim=6, nd=2 -> u dim 4; nx=32, nh=32, ny=4) ----
BATCH = 8
NU = 4          # control input dim (input_dim - nd)
ND = 2          # disturbance dim
NX = 32         # state dim
NH = 32         # hidden dim
NY = 4          # output dim

K_IN = NX + NU + ND          # 38  : fused [z | u | d] contraction dim
N_BIG = NH + NX + NY         # 68  : fused [alpha_pre | dz_lin | y] output dim
OUT_LANES = 128              # lane-dense output slab width

# weight-slab row layout (8-row-aligned blocks, 128 lanes, f32)
R_W1 = 0                     # rows   0:38   fused input weights [K_IN, N_BIG]
R_W2 = 40                    # rows  40:72   Wh.T                [NH, NH]
R_W3 = 72                    # rows  72:104  (Bu @ Wout).T       [NH, NX]
R_B = 104                    # row 104 = bay | 105 = bh | 106 = bout @ Bu.T
SLAB_ROWS = 112
SLAB_COLS = 128


def flnssm_kernel(z_ref, inp_ref, w_ref, out_ref):
    """FLNSSM single step, fully VMEM resident, 3 MXU dots.

    big   = [z|u|d] @ W1          (W1 columns: alpha_pre | dz_lin | y)
    h1    = tanh(big[:, 0:NH] + bay)
    h2    = tanh(h1 @ Wh.T + bh)
    dz    = big[:, NH:NH+NX] + h2 @ (Bu@Wout).T + bout@Bu.T
    y     = big[:, NH+NX:NH+NX+NY]
    """
    z = z_ref[...]                                           # [B, NX]
    ud = inp_ref[...]                                        # [B, NU+ND]
    zud = jnp.concatenate([z, ud], axis=1)                   # [B, K_IN]

    # fused input-stage dot: alpha_pre | dz_lin | y in one MXU pass
    W1 = w_ref[R_W1:R_W1 + K_IN, 0:N_BIG]                    # [K_IN, N_BIG]
    big = jnp.dot(zud, W1, preferred_element_type=jnp.float32)   # [B, N_BIG]

    bay = w_ref[R_B + 0:R_B + 1, 0:NH]                       # [1, NH]
    bh = w_ref[R_B + 1:R_B + 2, 0:NH]                        # [1, NH]
    b_dz = w_ref[R_B + 2:R_B + 3, 0:NX]                      # [1, NX]

    h1 = jnp.tanh(big[:, 0:NH] + bay)                        # [B, NH]

    W2 = w_ref[R_W2:R_W2 + NH, 0:NH]                         # Wh.T
    h2 = jnp.tanh(jnp.dot(h1, W2, preferred_element_type=jnp.float32) + bh)

    W3 = w_ref[R_W3:R_W3 + NH, 0:NX]                         # (Bu @ Wout).T
    dz = (big[:, NH:NH + NX]
          + jnp.dot(h2, W3, preferred_element_type=jnp.float32)
          + b_dz)                                            # [B, NX]
    y = big[:, NH + NX:NH + NX + NY]                         # [B, NY]

    # single lane-dense output slab: dz | y | zero-pad -> unmasked full store
    pad = jnp.zeros((BATCH, OUT_LANES - NX - NY), jnp.float32)
    out_ref[...] = jnp.concatenate([dz, y, pad], axis=1)


def _full_spec(shape):
    # whole-array block, single grid point
    return pl.BlockSpec(shape, lambda: tuple(0 for _ in shape))


def pack_params(params):
    """One-time wrapper-side weight fusion + packing into a single VMEM slab."""
    A, B, C = params["A"], params["B"], params["C"]
    Way, bay, Wad = params["Way"], params["bay"], params["Wad"]
    Wh, bh = params["Wh"], params["bh"]
    Wout, bout = params["Wout"], params["bout"]

    Bu = B[:, :NU]                    # [NX, NU]
    Bd = B[:, NU:NU + ND]             # [NX, ND]

    # fused input-stage weight [K_IN, N_BIG]
    # rows:  0:NX -> z, NX:NX+NU -> u, NX+NU:K_IN -> d
    # cols:  0:NH -> alpha_pre, NH:NH+NX -> dz_lin, NH+NX: -> y
    W1 = jnp.zeros((K_IN, N_BIG), jnp.float32)
    W1 = W1.at[0:NX, 0:NH].set((Way @ C).T)            # z -> alpha_pre (Way C)
    W1 = W1.at[NX + NU:K_IN, 0:NH].set(Wad.T)          # d -> alpha_pre
    W1 = W1.at[0:NX, NH:NH + NX].set(A.T)              # z -> dz_lin
    W1 = W1.at[NX:NX + NU, NH:NH + NX].set(Bu.T)       # u -> dz_lin
    W1 = W1.at[NX + NU:K_IN, NH:NH + NX].set(Bd.T)     # d -> dz_lin
    W1 = W1.at[0:NX, NH + NX:N_BIG].set(C.T)           # z -> y

    W2 = Wh.T                                          # [NH, NH]
    W3 = (Bu @ Wout).T                                 # [NH, NX]
    b_dz = bout @ Bu.T                                 # [1, NX]

    slab = jnp.zeros((SLAB_ROWS, SLAB_COLS), jnp.float32)
    slab = slab.at[R_W1:R_W1 + K_IN, 0:N_BIG].set(W1)
    slab = slab.at[R_W2:R_W2 + NH, 0:NH].set(W2)
    slab = slab.at[R_W3:R_W3 + NH, 0:NX].set(W3)
    slab = slab.at[R_B + 0, 0:NH].set(bay[0])
    slab = slab.at[R_B + 1, 0:NH].set(bh[0])
    slab = slab.at[R_B + 2, 0:NX].set(b_dz[0])
    return slab


@jax.jit
def flnssm_forward(inp, state, w_slab):
    """inp: [B, NU+ND] = [u|d], state: [B, NX] -> (dz [B, NX], y [B, NY])."""
    out = pl.pallas_call(
        flnssm_kernel,
        out_shape=jax.ShapeDtypeStruct((BATCH, OUT_LANES), jnp.float32),
        grid=(),
        in_specs=[_full_spec(state.shape),
                  _full_spec(inp.shape),
                  _full_spec(w_slab.shape)],
        out_specs=_full_spec((BATCH, OUT_LANES)),
    )(state, inp, w_slab)
    dz = out[:, :NX]
    y = out[:, NX:NX + NY]
    return dz, y


def flnssm_reference(inp, state, params):
    """Pure-JAX reference of the original (unfused) forward pass."""
    u = inp[:, :NU]
    d = inp[:, NU:NU + ND]
    z = state
    y = z @ params["C"].T
    alpha = jnp.tanh(y @ params["Way"].T + params["bay"] + d @ params["Wad"].T)
    alpha = jnp.tanh(alpha @ params["Wh"].T + params["bh"])
    alpha = alpha @ params["Wout"].T + params["bout"]
    u_full = jnp.concatenate([u + alpha, d], axis=1)
    dz = z @ params["A"].T + u_full @ params["B"].T
    return dz, y


def init_params(key):
    ks = jax.random.split(key, 10)
    n = functools.partial(jax.random.normal, dtype=jnp.float32)
    return {
        # NNLinear: A [nx,nx], B [nx, nu+nd], C [ny,nx]
        "A": 0.1 * n(ks[0], (NX, NX)),
        "B": 0.1 * n(ks[1], (NX, NU + ND)),
        "C": 0.1 * n(ks[2], (NY, NX)),
        # alpha_in_y: Linear(ny -> nh, bias=True)
        "Way": 0.1 * n(ks[3], (NH, NY)),
        "bay": 0.1 * n(ks[4], (1, NH)),
        # alpha_in_d: Linear(nd -> nh, bias=False)
        "Wad": 0.1 * n(ks[5], (NH, ND)),
        # alpha_hid dense0: Linear(nh -> nh)
        "Wh": 0.1 * n(ks[6], (NH, NH)),
        "bh": 0.1 * n(ks[7], (1, NH)),
        # alpha_out: Linear(nh -> nu)
        "Wout": 0.1 * n(ks[8], (NU, NH)),
        "bout": 0.1 * n(ks[9], (1, NU)),
    }


if __name__ == "__main__":
    key = jax.random.PRNGKey(0)
    k_in, k_st, k_p = jax.random.split(key, 3)

    inp = jax.random.normal(k_in, (BATCH, NU + ND), dtype=jnp.float32)   # [u | d]
    state = jax.random.normal(k_st, (BATCH, NX), dtype=jnp.float32)
    params = init_params(k_p)

    w_slab = pack_params(params)          # one-time weight fusion / packing

    dz, y = flnssm_forward(inp, state, w_slab)
    dz, y = jax.block_until_ready(dz), jax.block_until_ready(y)

    dz_ref, y_ref = flnssm_reference(inp, state, params)
    # slightly looser tolerance: pre-multiplied (Way@C, Bu@Wout) weights change
    # the f32 rounding order relative to the sequential reference.
    assert jnp.allclose(dz, dz_ref, atol=1e-4, rtol=1e-4), "dz mismatch"
    assert jnp.allclose(y, y_ref, atol=1e-4, rtol=1e-4), "y mismatch"

    print("KERNEL_OK")
</pallas_src>

<mosaic_0001>
module attributes {stable_mosaic.version = 11 : i64} {
  func.func @flnssm_kernel(%arg0: memref<8x32xf32, #tpu.memory_space<vmem>>, %arg1: memref<8x6xf32, #tpu.memory_space<vmem>>, %arg2: memref<112x128xf32, #tpu.memory_space<vmem>>, %arg3: memref<8x128xf32, #tpu.memory_space<vmem>>) attributes {dimension_semantics = [], scalar_prefetch = 0 : i64, scratch_operands = 0 : i64, tpu.core_type = #tpu.core_type<tc>} {
    %c0 = arith.constant 0 : index
    %c0_0 = arith.constant 0 : index
    %0 = vector.load %arg0[%c0, %c0_0] : memref<8x32xf32, #tpu.memory_space<vmem>>, vector<8x32xf32>
    %c0_1 = arith.constant 0 : index
    %c0_2 = arith.constant 0 : index
    %1 = vector.load %arg1[%c0_1, %c0_2] : memref<8x6xf32, #tpu.memory_space<vmem>>, vector<8x6xf32>
    %2 = tpu.concatenate %0, %1 in 1 : vector<8x32xf32>, vector<8x6xf32> -> vector<8x38xf32>
    %c0_3 = arith.constant 0 : index
    %c0_4 = arith.constant 0 : index
    %3 = vector.load %arg2[%c0_3, %c0_4] : memref<112x128xf32, #tpu.memory_space<vmem>>, vector<38x68xf32>
    %cst = arith.constant dense<0.000000e+00> : vector<8x68xf32>
    %4 = tpu.matmul %2, %3, %cst {dimension_numbers = #tpu.dot_dimension_numbers<[1], [0], [0], [1], [0, 0, 1, 1], [], []>} : vector<8x38xf32>, vector<38x68xf32>, vector<8x68xf32> -> vector<8x68xf32>
    %c104 = arith.constant 104 : index
    %c0_5 = arith.constant 0 : index
    %5 = vector.load %arg2[%c104, %c0_5] : memref<112x128xf32, #tpu.memory_space<vmem>>, vector<1x32xf32>
    %c105 = arith.constant 105 : index
    %c0_6 = arith.constant 0 : index
    %6 = vector.load %arg2[%c105, %c0_6] : memref<112x128xf32, #tpu.memory_space<vmem>>, vector<1x32xf32>
    %c106 = arith.constant 106 : index
    %c0_7 = arith.constant 0 : index
    %7 = vector.load %arg2[%c106, %c0_7] : memref<112x128xf32, #tpu.memory_space<vmem>>, vector<1x32xf32>
    %8 = vector.extract_strided_slice %4 {offsets = [0, 0], sizes = [8, 32], strides = [1, 1]} : vector<8x68xf32> to vector<8x32xf32>
    %9 = vector.broadcast %5 : vector<1x32xf32> to vector<8x32xf32>
    %10 = arith.addf %8, %9 : vector<8x32xf32>
    %11 = math.tanh %10 : vector<8x32xf32>
    %c40 = arith.constant 40 : index
    %c0_8 = arith.constant 0 : index
    %12 = vector.load %arg2[%c40, %c0_8] : memref<112x128xf32, #tpu.memory_space<vmem>>, vector<32x32xf32>
    %cst_9 = arith.constant dense<0.000000e+00> : vector<8x32xf32>
    %13 = tpu.matmul %11, %12, %cst_9 {dimension_numbers = #tpu.dot_dimension_numbers<[1], [0], [0], [1], [0, 0, 1, 1], [], []>} : vector<8x32xf32>, vector<32x32xf32>, vector<8x32xf32> -> vector<8x32xf32>
    %14 = vector.broadcast %6 : vector<1x32xf32> to vector<8x32xf32>
    %15 = arith.addf %13, %14 : vector<8x32xf32>
    %16 = math.tanh %15 : vector<8x32xf32>
    %c72 = arith.constant 72 : index
    %c0_10 = arith.constant 0 : index
    %17 = vector.load %arg2[%c72, %c0_10] : memref<112x128xf32, #tpu.memory_space<vmem>>, vector<32x32xf32>
    %18 = vector.extract_strided_slice %4 {offsets = [0, 32], sizes = [8, 32], strides = [1, 1]} : vector<8x68xf32> to vector<8x32xf32>
    %cst_11 = arith.constant dense<0.000000e+00> : vector<8x32xf32>
    %19 = tpu.matmul %16, %17, %cst_11 {dimension_numbers = #tpu.dot_dimension_numbers<[1], [0], [0], [1], [0, 0, 1, 1], [], []>} : vector<8x32xf32>, vector<32x32xf32>, vector<8x32xf32> -> vector<8x32xf32>
    %20 = arith.addf %18, %19 : vector<8x32xf32>
    %21 = vector.broadcast %7 : vector<1x32xf32> to vector<8x32xf32>
    %22 = arith.addf %20, %21 : vector<8x32xf32>
    %23 = vector.extract_strided_slice %4 {offsets = [0, 64], sizes = [8, 4], strides = [1, 1]} : vector<8x68xf32> to vector<8x4xf32>
    %cst_12 = arith.constant 0.000000e+00 : f32
    %24 = vector.broadcast %cst_12 : f32 to vector<8x92xf32>
    %25 = tpu.concatenate %22, %23, %24 in 1 : vector<8x32xf32>, vector<8x4xf32>, vector<8x92xf32> -> vector<8x128xf32>
    %c0_13 = arith.constant 0 : index
    %c0_14 = arith.constant 0 : index
    %26 = vector.load %arg3[%c0_13, %c0_14] : memref<8x128xf32, #tpu.memory_space<vmem>>, vector<8x128xf32>
    tpu.vector_store %arg3[%c0_13, %c0_14], %25 {strides = array<i32>} : memref<8x128xf32, #tpu.memory_space<vmem>>, vector<8x128xf32>,
    return
  }
}

</mosaic_0001>

<bundles_post_ra>
// kernel: flnssm_forward.1
= control target key start
LH: loop header
LB: loop body
LE: loop exit
PB: predicated region body
PF: predicated region fallthrough
CT: control target
= control target key end

     0   :  { %8 = vsyncpa [#allocation3], 0  ;;  %s581_s0 = inlined_call_operand.hbm [shape: f32[8,32], index: 0, kind: input, shape index: {}]   ;;  %s582_s1 = inlined_call_operand.hbm [shape: f32[8,6], index: 1, kind: input, shape index: {}]   ;;  %s583_s2 = inlined_call_operand.hbm [shape: f32[112,128], index: 2, kind: input, shape index: {}]   ;;  %s584_s3 = inlined_call_operand.vmem [shape: f32[8,128], index: 3, kind: output, shape index: {}]  }
   0x1   :  { %9 = vsyncpa [#allocation5], 0  ;;  %s502_s12 = smov [#allocation4]   ;;  %s503_s14 = smov [#allocation2]  }
   0x2   :  { %s26_s13 = sshll.u32 %s502_s12, 4  ;;  %s16_s15 = sshll.u32 %s503_s14, 4  ;;  %s27_s13 = int_to_ptr.vmem [resolvable:$true] %s26_s13  ;;  %s17_s15 = int_to_ptr.vmem [resolvable:$true] %s16_s15 }
   0x3   :  { %s432_s18 = scalar_lea.hbm %s582_s1, 128 }
   0x4   :  { %p433_p0 = scmp.ne.s32.totalorder %s582_s1, %s432_s18  ;;  %p436_p1 = scmp.lt.u32.totalorder %s432_s18, %s582_s1 }
   0x6   :  { %p438_p2 = pnand %p436_p1, %p433_p0 }
   0x8   :  { %441 = shalt.err (!%p438_p2)
}
   0x9   :  { %s442_s23 = scalar_lea.vmem %s27_s13, 128  ;;  %p447_p4 = scmp.lt.s32.totalorder %s27_s13, %s27_s13 }
   0xa   :  { %p443_p3 = scmp.ne.s32.totalorder %s27_s13, %s442_s23  ;;  %p448_p5 = scmp.lt.s32.totalorder %s442_s23, %s442_s23 }
   0xc   :  { %p449_p6 = por %p448_p5, %p447_p4 }
   0xe   :  { %p450_p7 = pnand %p449_p6, %p443_p3 }
  0x10   :  { %453 = shalt.err (!%p450_p7)
}
  0x11   :  { %29 = dma.hbm_to_vmem [thread:$0]  %s582_s1, 128, %s27_s13, [#allocation5]  }
  0x12   :  { %s454_s28 = scalar_lea.hbm %s581_s0, 128 }
  0x13   :  { %p455_p8 = scmp.ne.s32.totalorder %s581_s0, %s454_s28  ;;  %p458_p9 = scmp.lt.u32.totalorder %s454_s28, %s581_s0 }
  0x15   :  { %p460_p10 = pnand %p458_p9, %p455_p8 }
  0x17   :  { %463 = shalt.err (!%p460_p10)
}
  0x18   :  { %s464_s6 = scalar_lea.vmem %s17_s15, 128  ;;  %p469_p12 = scmp.lt.s32.totalorder %s17_s15, %s17_s15 }
  0x19   :  { %p465_p11 = scmp.ne.s32.totalorder %s17_s15, %s464_s6  ;;  %p470_p13 = scmp.lt.s32.totalorder %s464_s6, %s464_s6 }
  0x1b   :  { %p471_p0 = por %p470_p13, %p469_p12 }
  0x1d   :  { %p472_p1 = pnand %p471_p0, %p465_p11 }
  0x1f   :  { %475 = shalt.err (!%p472_p1)
}
  0x20   :  { %19 = dma.hbm_to_vmem [thread:$0]  %s581_s0, 128, %s17_s15, [#allocation3]  }
  0x21   :  { %s504_s8 = smov [#allocation6]   ;;  %s476_s12 = scalar_lea.hbm %s583_s2, 1792 }
  0x22   :  { %s35_s9 = sshll.u32 %s504_s8, 4  ;;  %p477_p2 = scmp.ne.s32.totalorder %s583_s2, %s476_s12  ;;  %s36_s9 = int_to_ptr.vmem [resolvable:$true] %s35_s9 }
  0x23   :  { %p480_p3 = scmp.lt.u32.totalorder %s476_s12, %s583_s2 }
  0x25   :  { %p482_p4 = pnand %p480_p3, %p477_p2 }
  0x27   :  { %485 = shalt.err (!%p482_p4)
}
  0x28   :  { %s486_s18 = scalar_lea.vmem %s36_s9, 1792  ;;  %p491_p6 = scmp.lt.s32.totalorder %s36_s9, %s36_s9 }
  0x29   :  { %p487_p5 = scmp.ne.s32.totalorder %s36_s9, %s486_s18  ;;  %p492_p7 = scmp.lt.s32.totalorder %s486_s18, %s486_s18 }
  0x2b   :  { %p493_p8 = por %p492_p7, %p491_p6 }
  0x2d   :  { %p494_p9 = pnand %p493_p8, %p487_p5 }
  0x2f   :  { %497 = shalt.err (!%p494_p9)
}
  0x30   :  { %s505_s0 = smov 128   ;;  %s506_s15 = smov 8  }
  0x31   :  { %41 = dma.hbm_to_vmem [thread:$0]  %s583_s2, 1792, %s36_s9, [#allocation5], %s505_s0, %s505_s0, %s506_s15  }
  0x32   :  { %498 = dma.done.wait [#allocation3], 128  }
  0x33   :  { %499 = vsyncadd [#allocation3], 4294967168 }
  0x34   :  { %500 = dma.done.wait [#allocation5], 1920  }
  0x35   :  { %501 = vsyncadd [#allocation5], 4294965376  ;;  %v507_v0 = vmov 0.0|0.0   ;;  %vm508_vm0 = vmmov 0   ;;  %v509_v1 = vmov 0.0   ;;  %v52_v2 = vld [vmem:[#allocation4] sm:$0xff] }
  0x36   :  { %400 = vmatprep.subr.bf16.mxu0 %v507_v0  ;;  %406 = vmatprep.subr.bf16.mxu1 %v507_v0  ;;  %v59_v3 = vld [vmem:[#allocation6] sm:$0xff]  ;;  %v60_v4 = vld [vmem:[#allocation6 + $0x8] sm:$0xff]  ;;  %s510_s21 = smov 32   ;;  %v61_v6 = vld [vmem:[#allocation6 + $0x10] sm:$0xff]  ;;  %vm68_vm1 = vcmask 1045504   ;;  %vm57_vm2 = vcmask 261120  }
  0x37   :  { %375 = vmatprep.mubr.msk.f32.mxu0 %vm508_vm0, %v509_v1  ;;  %386 = vmatprep.mubr.msk.f32.mxu1 %vm508_vm0, %v509_v1  ;;  %v401_v5 = vpack.c.bf16 %v60_v4, %v59_v3  ;;  %v62_v7 = vld [vmem:[#allocation6 + $0x18] sm:$0xff]  ;;  %v63_v9 = vld [vmem:[#allocation6 + $0x20] sm:$0x3f]  ;;  %v51_v10 = vld [vmem:[#allocation2] sm:$0xff]  ;;  %vm64_vm3 = vcmask 310272   ;;  %s511_s2 = smov 96  }
  0x38   :  { %54 = vrot.lane.b32.xlu0 %v52_v2, %s510_s21  ;;  %v404_v8 = vpack.c.bf16 %v62_v7, %v61_v6  ;;  %v151_v13 = vld [vmem:[#allocation6 + $0x28] sm:$0xff]  ;;  %v152_v14 = vld [vmem:[#allocation6 + $0x30] sm:$0xff]  ;;  %v153_v15 = vld [vmem:[#allocation6 + $0x38] sm:$0xff]  ;;  %vm333_vm4 = vcmask 293888  }
  0x39   :  { %402 = vmatpush3.bf16.msra.mxu0 %v401_v5  ;;  %v407_v16 = vpack.c.bf16 %v152_v14, %v151_v13  ;;  %v154_v17 = vld [vmem:[#allocation6 + $0x40] sm:$0xff]  ;;  %v344_v19 = vld [vmem:[#allocation6 + $0x68] ss:$0 sm:$0xff]  ;;  %v234_v25 = vld [vmem:[#allocation6 + $0x50] sm:$0xff] }
  0x3a   :  { %403 = vmatprep.subr.bf16.mxu0 %v507_v0  ;;  %v410_v18 = vpack.c.bf16 %v154_v17, %v153_v15  ;;  %v233_v24 = vld [vmem:[#allocation6 + $0x48] sm:$0xff]  ;;  %v235_v26 = vld [vmem:[#allocation6 + $0x58] sm:$0xff]  ;;  %v236_v28 = vld [vmem:[#allocation6 + $0x60] sm:$0xff] }
  0x3b   :  { %408 = vmatpush3.bf16.msra.mxu1 %v407_v16  ;;  %v413_v27 = vpack.c.bf16 %v234_v25, %v233_v24  ;;  %v416_v29 = vpack.c.bf16 %v236_v28, %v235_v26  ;;  %v345_v30 = vld [vmem:[#allocation6 + $0x69] ss:$0 sm:$0xff]  ;;  %v348_v35 = vld [vmem:[#allocation6 + $0x6a] ss:$0 sm:$0xff] }
  0x3c   :  { %409 = vmatprep.subr.bf16.mxu1 %v507_v0  ;;  %320 = vrot.lane.b32.xlu1 %v348_v35, %s510_s21 }
  0x3d   :  { %405 = vmatpush3.bf16.msra.mxu0 %v404_v8 }
  0x3e   :  { %373 = vmatprep.subr.mxu0 %v509_v1 }
  0x3f   :  { %411 = vmatpush3.bf16.msra.mxu1 %v410_v18 }
  0x40   :  { %412 = vmatprep.subr.bf16.mxu1 %v507_v0 }
  0x41   :  { %374 = vmatpush3.msk.msra.mxu0 %vm68_vm1, %v63_v9 }
  0xaa   :  { %v55_v11 = vpop.permute.xlu0 %54 }
  0xab   :  { %v58_v12 = vsel %vm57_vm2, %v51_v10, %v55_v11 }
  0xac   :  { %376 = vmatmul.mubr.msk.f32.vlgmr.msra.gmra.mrb[0].mxu0 %vm64_vm3, %v58_v12 }
  0xae   :  { %v321_v39 = vpop.permute.xlu1 %320 }
 0x17f   :  { %v138_v20 = vpop.f32.mrb[0].mxu0 }
 0x180   :  { %v149_v21 = vadd.f32 %v344_v19, %v138_v20  ;;  %v377_v22 = vpop.f32.mrb[1].mxu0 }
 0x182   :  { %428 = vtanh.f32 %v149_v21 }
 0x18c   :  { %v429_v23 = vpop.eup %428 }
 0x18d   :  { %387 = vmatmul.mubr.msk.f32.vlgmr.msra.gmra.mrb[0].mxu1 %vm57_vm2, %v429_v23 }
 0x18e   :  { %397 = vmatprep.mubr.msk.f32.mxu1 %vm508_vm0, %v509_v1  ;;  %414 = vmatpush3.bf16.msra.mxu1 %v413_v27 }
 0x18f   :  { %415 = vmatprep.subr.bf16.mxu1 %v507_v0 }
 0x192   :  { %417 = vmatpush3.bf16.msra.mxu1 %v416_v29 }
 0x260   :  { %v228_v31 = vpop.f32.mrb[0].mxu1 }
 0x261   :  { %v229_v32 = vadd.f32 %v345_v30, %v228_v31  ;;  %v388_v33 = vpop.f32.mrb[1].mxu1 }
 0x263   :  { %430 = vtanh.f32 %v229_v32 }
 0x26d   :  { %v431_v34 = vpop.eup %430 }
 0x26e   :  { %398 = vmatmul.mubr.msk.f32.vlgmr.msra.gmra.mrb[2].mxu1 %vm57_vm2, %v431_v34 }
 0x341   :  { %v306_v36 = vpop.f32.mrb[2].mxu1 }
 0x342   :  { %311 = vrot.lane.b32.xlu0 %v306_v36, %s510_s21  ;;  %v399_v37 = vpop.f32.mrb[3].mxu1 }
 0x346   :  { %329 = vrot.lane.b32.xlu0 %v138_v20, %s511_s2 }
 0x3b4   :  { %v312_v38 = vpop.permute.xlu0 %311 }
 0x3b5   :  { %v314_v40 = vadd.f32 %v312_v38, %v138_v20 }
 0x3b7   :  { %v323_v41 = vadd.f32 %v321_v39, %v314_v40 }
 0x3b8   :  { %v330_v42 = vpop.permute.xlu0 %329 }
 0x3b9   :  { %325 = vrot.lane.b32.xlu1 %v323_v41, %s511_s2 }
 0x42b   :  { %v326_v43 = vpop.permute.xlu1 %325 }
 0x42c   :  { %v332_v44 = vsel %vm57_vm2, %v326_v43, %v330_v42 }
 0x42d   :  { %v334_v45 = vsel %vm333_vm4, %v332_v44, 0.0 }
 0x42e   :  { %335 = vst [vmem:[%s584_s3] sm:$0xff] %v334_v45 }
 0x42f   :  { %340 = vsyncpa [#allocation3], 1 }
 0x430   :  { %341 = vsyncpa [#allocation5], 1 }

</bundles_post_ra>
